<compile_context>
chip_gen: v6e
topology: v6e:2x2x1
jax: 0.10.0
libtpu: 0.0.40
codegen_flags: <defaults>
</compile_context>

<pallas_src>
import functools

import jax
import jax.numpy as jnp
from jax.experimental import pallas as pl
from jax.experimental.pallas import tpu as pltpu

_LANE = 128            # vreg lane width: keep the last dim a multiple of 128
_SUBLANE = 8           # vreg sublane count (f32)
_MAX_BLOCK_ROWS = 4096 # f32 tile = 4096*128*4 B = 2 MiB; in+out double-buffered
                       # = 8 MiB -> safe under default scoped VMEM everywhere


def _silu_kernel(x_ref, o_ref, *, compute_dtype):
    """Elementwise SiLU on one tile: y = x * sigmoid(x).

    sigmoid(x) = 0.5 * (tanh(0.5 * x) + 1): a single EUP transcendental per
    element; the muls/adds run on the VPU.  Compute dtype is f32 on chips
    without bf16 VPU/EUP support, native otherwise.
    """
    x = x_ref[...].astype(compute_dtype)
    half = jnp.asarray(0.5, dtype=compute_dtype)
    one = jnp.asarray(1.0, dtype=compute_dtype)
    sig = half * (jnp.tanh(x * half) + one)
    o_ref[...] = (x * sig).astype(o_ref.dtype)


def _silu_jnp(x):
    """Plain-JAX SiLU for sub-128-element tails (not worth a Pallas launch)."""
    xf = x.astype(jnp.float32)
    return (xf * jax.nn.sigmoid(xf)).astype(x.dtype)


def _compute_dtype(dtype):
    """Pick the in-kernel compute dtype.

    v6e/v7x have bf16 VPU/EUP paths; v5e and older do not, so sub-32-bit
    inputs are upcast to f32 there (compute f32, store native).
    """
    if dtype == jnp.float32:
        return jnp.float32
    try:
        kind = jax.devices()[0].device_kind.lower()
    except Exception:  # pragma: no cover - e.g. interpret mode / no devices
        kind = ""
    native_bf16 = ("v6" in kind) or ("v7" in kind)
    if dtype == jnp.bfloat16 and native_bf16:
        return jnp.bfloat16
    return jnp.float32


def pallas_silu(x, *, donate=False):
    """Pallas-backed equivalent of `lambda x: x * torch.sigmoid(x)`."""
    orig_shape = x.shape
    dtype = x.dtype

    flat = x.reshape(-1)
    n = flat.shape[0]
    rows = n // _LANE
    rem = n - rows * _LANE

    if rows == 0:
        # Fewer than 128 elements total: launch overhead dwarfs the work.
        return _silu_jnp(flat).reshape(orig_shape)

    # Lane-dense prefix slab; the <128-element tail (if any) is handled by a
    # tiny jnp op below -- no full-tensor pad/slice HBM round-trips.
    head = flat[: rows * _LANE].reshape(rows, _LANE) if rem else flat.reshape(
        rows, _LANE)

    if rows < 2 * _SUBLANE:
        # Too small to split: one block equal to the full array (no (8,128)
        # divisibility requirement when block == array dims).
        block_rows = rows
    else:
        # At least 2 blocks so the "parallel" axis feeds both v7x TensorCores;
        # rows per block rounded up to a sublane multiple and capped at the
        # 2 MiB/buffer tile.
        half_rows = pl.cdiv(rows, 2)
        half_rows = pl.cdiv(half_rows, _SUBLANE) * _SUBLANE
        block_rows = min(_MAX_BLOCK_ROWS, half_rows)

    grid = (pl.cdiv(rows, block_rows),)
    compute_dtype = _compute_dtype(dtype)
    kernel = functools.partial(_silu_kernel, compute_dtype=compute_dtype)

    n_head = rows * _LANE
    itemsize = jnp.dtype(dtype).itemsize
    cost = pl.CostEstimate(
        flops=4 * n_head,                 # 3 muls + 1 add per element
        transcendentals=n_head,           # one tanh per element
        bytes_accessed=2 * n_head * itemsize,
    )

    # NOTE: if profiling on v7x shows per-step DMA still exposed at this tile
    # size, sweep pipeline_mode=pl.Buffered(3) on these BlockSpecs.
    head_out = pl.pallas_call(
        kernel,
        out_shape=jax.ShapeDtypeStruct((rows, _LANE), dtype),
        grid=grid,
        in_specs=[pl.BlockSpec((block_rows, _LANE), lambda i: (i, 0))],
        out_specs=pl.BlockSpec((block_rows, _LANE), lambda i: (i, 0)),
        compiler_params=pltpu.CompilerParams(
            dimension_semantics=("parallel",)),
        cost_estimate=cost,
        input_output_aliases={0: 0} if donate else {},
    )(head)

    if rem:
        tail_out = _silu_jnp(flat[rows * _LANE:])
        out = jnp.concatenate([head_out.reshape(-1), tail_out])
    else:
        out = head_out.reshape(-1)
    return out.reshape(orig_shape)


class LambdaLayer:
    """JAX/Pallas mirror of the PyTorch LambdaLayer: forward(x) = lambd(x)."""

    def __init__(self, lambd):
        self.lambd = lambd

    def __call__(self, x):
        return self.lambd(x)


if __name__ == "__main__":
    key = jax.random.PRNGKey(0)
    # NCHW, matching the PyTorch convention: batch=2, channels=4, spatial=16.
    x = jax.random.normal(key, (2, 4, 16, 16), dtype=jnp.float32)

    layer = LambdaLayer(pallas_silu)
    y = jax.block_until_ready(layer(x))

    # Reference check against the plain-JAX definition of the same lambda.
    # The tanh-form sigmoid is exact (no approx reciprocal), so the tolerance
    # is tight.
    y_ref = x * jax.nn.sigmoid(x)
    assert y.shape == x.shape and y.dtype == x.dtype
    assert jnp.allclose(y, y_ref, atol=1e-4, rtol=1e-4), float(
        jnp.max(jnp.abs(y - y_ref)))

    print("KERNEL_OK")
</pallas_src>

<mosaic_0001>
module attributes {stable_mosaic.version = 11 : i64} {
  func.func @_silu_kernel(%arg0: i32, %arg1: memref<8x128xf32, #tpu.memory_space<vmem>>, %arg2: memref<8x128xf32, #tpu.memory_space<vmem>>) attributes {dimension_semantics = [#tpu.dimension_semantics<parallel>], iteration_bounds = array<i64: 2>, scalar_prefetch = 0 : i64, scratch_operands = 0 : i64, tpu.core_type = #tpu.core_type<tc>, window_params = [{transform_indices = @transform_0, window_bounds = array<i64: 8, 128>}, {transform_indices = @transform_1, window_bounds = array<i64: 8, 128>}]} {
    %c0 = arith.constant 0 : index
    %c0_0 = arith.constant 0 : index
    %0 = vector.load %arg1[%c0, %c0_0] : memref<8x128xf32, #tpu.memory_space<vmem>>, vector<8x128xf32>
    %cst = arith.constant 5.000000e-01 : f32
    %1 = vector.broadcast %cst : f32 to vector<8x128xf32>
    %2 = arith.mulf %0, %1 : vector<8x128xf32>
    %3 = math.tanh %2 : vector<8x128xf32>
    %cst_1 = arith.constant 1.000000e+00 : f32
    %4 = vector.broadcast %cst_1 : f32 to vector<8x128xf32>
    %5 = arith.addf %3, %4 : vector<8x128xf32>
    %cst_2 = arith.constant 5.000000e-01 : f32
    %6 = vector.broadcast %cst_2 : f32 to vector<8x128xf32>
    %7 = arith.mulf %6, %5 : vector<8x128xf32>
    %8 = arith.mulf %0, %7 : vector<8x128xf32>
    %c0_3 = arith.constant 0 : index
    %c0_4 = arith.constant 0 : index
    %9 = vector.load %arg2[%c0_3, %c0_4] : memref<8x128xf32, #tpu.memory_space<vmem>>, vector<8x128xf32>
    tpu.vector_store %arg2[%c0_3, %c0_4], %8 {strides = array<i32>} : memref<8x128xf32, #tpu.memory_space<vmem>>, vector<8x128xf32>,
    return
  }
  func.func @transform_0(%arg0: i32) -> (i32, i32) {
    %c0_i32 = arith.constant 0 : i32
    %c0_i32_0 = arith.constant 0 : i32
    return %arg0, %c0_i32 : i32, i32
  }
  func.func @transform_1(%arg0: i32) -> (i32, i32) {
    %c0_i32 = arith.constant 0 : i32
    %c0_i32_0 = arith.constant 0 : i32
    return %arg0, %c0_i32 : i32, i32
  }
}

</mosaic_0001>

<bundles_post_ra>
// kernel: tpu_custom_call.1
= control target key start
LH: loop header
LB: loop body
LE: loop exit
PB: predicated region body
PF: predicated region fallthrough
CT: control target
= control target key end

     0   :  { %6 = vsyncpa [#allocation3], 0  ;;  %s530_s0 = inlined_call_operand.hbm [shape: f32[16,128], index: 0, kind: input, shape index: {}]   ;;  %s531_s1 = inlined_call_operand.hbm [shape: f32[16,128], index: 1, kind: output, shape index: {}]  }
   0x1   :  { %8 = vsyncpa [#allocation3 + $0x1], 0 }
   0x2   :  { %9 = vsyncpa [#allocation4], 0 }
   0x3   :  { %11 = vsyncpa [#allocation4 + $0x1], 0  ;;  %s389_s6 = smov 0   ;;  %s391_s7 = smov 0  }
   0x4   :  { %s393_s8 = smov 0   ;;  %s395_s9 = smov 0  }
   0x5 LB: > { %s410_s10 = sadd.s32 4294967295, %s375_s9   ;;  %s223_s11 = sadd.s32 4294967294, %s375_s9   ;;  %s375_s9 = sphi %s395_s9, %s548_s9   ;;  %s371_s8 = sphi %s393_s8, %s547_s8   ;;  %s367_s7 = sphi %s391_s7, %s546_s7   ;;  %s363_s6 = sphi %s389_s6, %s545_s6  }
   0x6   : > { %s414_s12 = sadd.s32 1, %s375_s9   ;;  %s24_s13 = sadd.s32 1, %s371_s8 }
   0x7   : > { %s21_s14 = ssub.s32 %s375_s9, %s414_s12  ;;  %p31_p0 = scmp.ne.s32.totalorder %s371_s8, %s367_s7 }
   0x8   : > { %p22_p1 = scmp.eq.s32.totalorder %s21_s14, 0  ;;  %p32_p2 = scmp.eq.s32.totalorder %s375_s9, 0 }
   0x9   : > { %p37_p3 = scmp.ne.s32.totalorder %s367_s7, %s363_s6  ;;  %p38_p4 = scmp.eq.s32.totalorder %s410_s10, 0 }
   0xa   : > { %s426_s15 = scalar_select %p22_p1, %s371_s8, %s24_s13  }
   0xb   : > { %p428_p5 = por %p32_p2, %p31_p0  ;;  %p432_p6 = por %p38_p4, %p37_p3 }
   0xc   : > { %p61_p7 = scmp.eq.s32.totalorder %s410_s10, 1  ;;  %p67_p8 = scmp.eq.s32.totalorder %s223_s11, 1 }
   0xd   : > { %s535_s17 = scalar_select %p432_p6, 1, 0 }
   0xe   : > { %p247_p10 = scmp.lt.s32.totalorder %s375_s9, 2  ;;  %p439_p11 = por %p61_p7, %p31_p0 }
   0xf   : > { %p443_p12 = por %p67_p8, %p37_p3  ;;  %s87_s20 = sand.u32 1, %s371_s8  }
  0x10   : > { %s536_s18 = scalar_select %p439_p11, 1, 0 }
  0x11   : > { %s537_s19 = scalar_select %p443_p12, 1, 0 }
  0x12   : > { %s227_s21 = sshll.u32 %s375_s9, 7  ;;  %s226_s22 = sshll.u32 %s87_s20, 3 }
  0x13   : > { %s452_s25 = scalar_lea.hbm %s530_s0, %s227_s21  ;;  %s91_s26 = scalar_lea.vmem [#allocation2], %s226_s22 }
  0x14   : > { %s98_s27 = sshll.u32 %s91_s26, 4  ;;  %p456_p13 = pnand %p247_p10, %p428_p5  ;;  %s460_s27 = int_to_ptr.vmem [resolvable:$true] %s98_s27 }
  0x15   : > { %s88_s29 = scalar_lea.sflag [#allocation3], %s87_s20  ;;  %s283_s30 = scalar_lea.hbm %s452_s25, 128 }
  0x16   : > { %p284_p2 = scmp.ne.s32.totalorder %s452_s25, %s283_s30  ;;  %p285_p3 = pneg %p456_p13 }
  0x17   : > { %s288_s4 = scalar_lea.hbm %s530_s0, 256  ;;  %p289_p5 = scmp.lt.s32.totalorder %s452_s25, %s530_s0 }
  0x18   : > { %p286_p4 = pnand %p285_p3, %p284_p2  ;;  %p290_p8 = scmp.lt.s32.totalorder %s288_s4, %s283_s30 }
  0x1a   : > { %p287_p7 = pneg %p286_p4  ;;  %p291_p10 = por %p290_p8, %p289_p5 }
  0x1c   : > { %p292_p9 = pnand %p291_p10, %p287_p7 }
  0x1e   : > { %295 = shalt.err (!%p292_p9)
}
  0x1f   : > { %s296_s13 = scalar_lea.vmem %s460_s27, 128  ;;  %s377_s14 = smov [#allocation2]  }
  0x20   : > { %p297_p0 = scmp.ne.s32.totalorder %s460_s27, %s296_s13  ;;  %s301_s16 = sshll.u32 %s377_s14, 4  ;;  %s302_s16 = int_to_ptr.vmem [resolvable:$false] %s301_s16 }
  0x21   : > { %s303_s20 = scalar_lea.vmem %s302_s16, 256  ;;  %p304_p4 = scmp.lt.s32.totalorder %s460_s27, %s302_s16 }
  0x22   : > { %p299_p1 = pnand %p297_p0, %p285_p3  ;;  %p305_p12 = scmp.lt.s32.totalorder %s303_s20, %s296_s13 }
  0x24   : > { %p300_p2 = pneg %p299_p1  ;;  %p306_p11 = por %p305_p12, %p304_p4 }
  0x26   : > { %p307_p6 = pnand %p306_p11, %p300_p2 }
  0x28   : > { %310 = shalt.err (!%p307_p6)
}
  0x29   : > { %242 = dma.hbm_to_vmem [thread:$0]  (!%p456_p13), %s452_s25, 128, %s460_s27, %s88_s29  }
  0x2a   : > { %p539_p9 = scmp.lt.s32.totalorder %s375_s9, 3  ;;  %p540_p7 = scmp.ge.s32.totalorder %s375_s9, 1 }
  0x2c   : > { %p104_p0 = pnand %p540_p7, %p539_p9 }
  0x2d   : > { %s487_s21 = sand.u32 (!%p104_p0), 1, %s367_s7   ;;  %p541_p6 = scmp.ne.s32.totalorder (!%p104_p0), %s535_s17, 0 }
  0x2e   : > { %107 = sbr.rel (%p104_p0) target bundleno = 88 (0x58), region = 24  ;;  %s229_s22 = sshll.u32 (!%p104_p0), %s487_s21, 3 }
  0x2f   : > { %s110_s23 = scalar_lea.sflag (!%p104_p0), [#allocation3], %s487_s21  ;;  %s113_s24 = scalar_lea.vmem (!%p104_p0), [#allocation2], %s229_s22 }
  0x33   : > { %354 = dma.done.wait (%p541_p6), %s110_s23, 128  }
  0x34   : > { %356 = vsyncadd (%p541_p6), %s110_s23, 4294967168  ;;  %v132_v0 = vld [vmem:[%s113_s24] sm:$0xff]  ;;  %s131_s25 = scalar_lea.vmem [#allocation5], %s229_s22  ;;  %s232_s27 = sshll.u32 %s410_s10, 7 }
  0x35   : > { %v133_v1 = vmul.f32 0.5, %v132_v0  ;;  %s153_s26 = sshll.u32 %s131_s25, 4  ;;  %s151_s30 = scalar_lea.hbm %s531_s1, %s232_s27  ;;  %s154_s26 = int_to_ptr.vmem [resolvable:$true] %s153_s26 }
  0x36   : > { %s140_s17 = scalar_lea.sflag [#allocation4], %s487_s21  ;;  %s311_s2 = scalar_lea.vmem %s154_s26, 128 }
  0x37   : > { %281 = vtanh.f32 %v133_v1  ;;  %p312_p11 = scmp.ne.s32.totalorder %s154_s26, %s311_s2  ;;  %p542_p12 = scmp.ne.s32.totalorder %s536_s18, 0 }
  0x38   : > { %s378_s3 = smov [#allocation5]  }
  0x39   : > { %p313_p13 = pnand %p312_p11, %p542_p12  ;;  %s315_s4 = sshll.u32 %s378_s3, 4  ;;  %s316_s4 = int_to_ptr.vmem [resolvable:$false] %s315_s4 }
  0x3a   : > { %s317_s5 = scalar_lea.vmem %s316_s4, 256  ;;  %p318_p3 = scmp.lt.s32.totalorder %s154_s26, %s316_s4 }
  0x3b   : > { %p314_p1 = pneg %p313_p13  ;;  %p319_p5 = scmp.lt.s32.totalorder %s317_s5, %s311_s2 }
  0x3d   : > { %p320_p8 = por %p319_p5, %p318_p3 }
  0x3f   : > { %p321_p10 = pnand %p320_p8, %p314_p1 }
  0x44   : > { %v282_v2 = vpop.eup %281 }
  0x45   : > { %v135_v3 = vadd.f32 1.0, %v282_v2 }
  0x47   : > { %v136_v4 = vmul.f32 0.5, %v135_v3 }
  0x49   : > { %v137_v5 = vmul.f32 %v136_v4, %v132_v0 }
  0x4b   : > { %138 = vst [vmem:[%s131_s25] sm:$0xff] %v137_v5 }
  0x4c   : > { %324 = shalt.err (!%p321_p10)
}
  0x4d   : > { %s325_s10 = scalar_lea.hbm %s151_s30, 128  ;;  %s329_s14 = scalar_lea.hbm %s531_s1, 256 }
  0x4e   : > { %p326_p2 = scmp.ne.s32.totalorder %s151_s30, %s325_s10  ;;  %p330_p7 = scmp.lt.s32.totalorder %s151_s30, %s531_s1 }
  0x4f   : > { %p331_p0 = scmp.lt.s32.totalorder %s329_s14, %s325_s10 }
  0x50   : > { %p327_p4 = pnand %p326_p2, %p542_p12 }
  0x51   : > { %p332_p6 = por %p331_p0, %p330_p7 }
  0x52   : > { %p328_p9 = pneg %p327_p4 }
  0x54   : > { %p333_p11 = pnand %p332_p6, %p328_p9 }
  0x56   : > { %336 = shalt.err (!%p333_p11)
}
  0x57   : > { %237 = dma.vmem_to_hbm [thread:$0]  (%p542_p12), %s154_s26, 128, %s151_s30, %s140_s17  }
  0x58 PF: > { %s165_s21 = sand.u32 1, %s363_s6   ;;  %p543_p13 = scmp.ne.s32.totalorder %s537_s19, 0 }
  0x59   : > { %p544_p1 = scmp.ge.s32.totalorder %s375_s9, 2  ;;  %s166_s22 = scalar_lea.sflag [#allocation4], %s165_s21 }
  0x5b   : > { %p244_p3 = pnand %p544_p1, %p543_p13 }
  0x5d   : > { %p245_p5 = pneg %p244_p3 }
  0x5f   : > { %358 = dma.done.wait (%p245_p5), %s166_s22, 128  }
  0x60   : > { %360 = vsyncadd (%p245_p5), %s166_s22, 4294967168  ;;  %p14_p8 = scmp.ge.s32.totalorder %s414_s12, 4   ;;  %s545_s6 = smov %s367_s7 }
  0x61   : > { %s546_s7 = smov %s371_s8  ;;  %s547_s8 = smov %s426_s15 }
  0x62   : > { %s548_s9 = smov %s414_s12  ;;  %16 = sbr.rel (!%p14_p8) target bundleno = 5 (0x5), region = 69 }
  0x67   :  { %171 = vsyncpa [#allocation3], 1 }
  0x68   :  { %173 = vsyncpa [#allocation3 + $0x1], 1 }
  0x69   :  { %174 = vsyncpa [#allocation4], 1 }
  0x6a   :  { %176 = vsyncpa [#allocation4 + $0x1], 1 }

</bundles_post_ra>
